<compile_context>
chip_gen: v7x
topology: tpu7x:2x2x1
jax: 0.10.0
libtpu: 0.0.40
codegen_flags: <defaults>
</compile_context>

<pallas_src>
import functools

import numpy as np
import jax
import jax.numpy as jnp
from jax.experimental import pallas as pl
from jax.experimental.pallas import tpu as pltpu

F_DIM = 6
K_FEAT = 64
N_TILE = 256           # points per grid step (multiple of 8)


# ---------------------------------------------------------------------------
# VMEM limit (per-generation; v7x has only 64 MiB per TensorCore)
# ---------------------------------------------------------------------------
def _vmem_limit_bytes():
    mib = 1024 * 1024
    cap = None
    try:
        info = pltpu.get_tpu_info()
        cap = getattr(info, "vmem_capacity_bytes", None)
    except Exception:
        cap = None
    if not cap:
        cap = 64 * mib          # conservative fallback (v7x per-TC VMEM)
    # Leave headroom for compiler-internal scratch; never ask for >96 MiB.
    return int(max(32 * mib, min(cap * 3 // 4, 96 * mib)))


_VMEM_LIMIT = _vmem_limit_bytes()


def _round_up(x, m):
    return (x + m - 1) // m * m


def _const_spec(shape):
    # Whole array, same block for every grid step (weights / biases stay resident).
    return pl.BlockSpec(tuple(shape), lambda *_: (0,) * len(shape))


# ---------------------------------------------------------------------------
# Kernels
# ---------------------------------------------------------------------------
def stn_kernel(x_ref, w1_ref, b1_ref, w2_ref, b2_ref,
               wf1_ref, bf1_ref, wf2_ref, bf2_ref,
               out_ref, gmax_ref, *, n_valid, tile_n):
    """STNkd forward, tiled over the N (points) axis.

    Grid = (B, n_tiles); the N axis is a reduction ("arbitrary").  Per tile we run
    conv1/conv2 (1x1 convs == matmuls), fold the tile into a running max held in a
    (1, 256) f32 VMEM scratch, and at the last tile run the FC head.  Weights are
    pre-transposed to (in, out) and pre-cast to bf16; biases are f32 (1, out); the
    eye(k).flatten() residual is folded into bf2 outside the kernel.
    Output: (1, 1, k*k) flattened transform.
    """
    n = pl.program_id(1)

    @pl.when(n == 0)
    def _init():
        gmax_ref[...] = jnp.full_like(gmax_ref, -jnp.inf)

    x = x_ref[0].astype(jnp.bfloat16)                                   # (tn, k)
    h1 = jnp.maximum(
        jnp.dot(x, w1_ref[...], preferred_element_type=jnp.float32) + b1_ref[...], 0.0)
    h2 = jnp.maximum(
        jnp.dot(h1.astype(jnp.bfloat16), w2_ref[...],
                preferred_element_type=jnp.float32) + b2_ref[...], 0.0)  # (tn, 256) f32

    # Mask rows past the true N (padding) so they never win the global max.
    row0 = n * tile_n
    rows = jax.lax.broadcasted_iota(jnp.int32, h2.shape, 0) + row0
    h2 = jnp.where(rows < n_valid, h2, -jnp.inf)
    gmax_ref[...] = jnp.maximum(gmax_ref[...], jnp.max(h2, axis=0, keepdims=True))

    @pl.when(n == pl.num_programs(1) - 1)
    def _head():
        g = gmax_ref[...].astype(jnp.bfloat16)                           # (1, 256)
        f1 = jnp.maximum(
            jnp.dot(g, wf1_ref[...], preferred_element_type=jnp.float32)
            + bf1_ref[...], 0.0)
        f2 = jnp.dot(f1.astype(jnp.bfloat16), wf2_ref[...],
                     preferred_element_type=jnp.float32) + bf2_ref[...]
        out_ref[0] = f2                                                  # (1, k*k)


def bmm_conv_relu_kernel(x_ref, t_ref, w_ref, b_ref, o_ref):
    """y = relu( (x @ trans) @ Wc1 + bc1 ) for one (batch, N-tile)."""
    x = x_ref[0].astype(jnp.bfloat16)                                    # (tn, f)
    t = t_ref[0].astype(jnp.bfloat16)                                    # (f, f)
    xt = jnp.dot(x, t, preferred_element_type=jnp.float32)               # (tn, f) f32
    h = jnp.dot(xt.astype(jnp.bfloat16), w_ref[...],
                preferred_element_type=jnp.float32) + b_ref[...]          # (tn, K) f32
    o_ref[0] = jnp.maximum(h, 0.0)


def bmm_nt_kernel(y_ref, t_ref, o_ref):
    """out[k, n] = sum_c trans[c, k] * y[n, c]  -> lane-dense (K, tn) output tile.

    Equivalent to (y @ trans).T per batch, i.e. the PyTorch bmm followed by the
    final transpose back to (B, K, N), done in-kernel so stores are unmasked and
    no wrapper transpose pass is needed.
    """
    y = y_ref[0].astype(jnp.bfloat16)                                    # (tn, K)
    t = t_ref[0].astype(jnp.bfloat16)                                    # (K, K)
    o_ref[0] = jax.lax.dot_general(
        t, y, (((0,), (1,)), ((), ())),
        preferred_element_type=jnp.float32)                              # (K, tn)


# ---------------------------------------------------------------------------
# pallas_call wrappers
# ---------------------------------------------------------------------------
def run_stn(x_bnc, kparams, n_valid, n_tile=N_TILE):
    B, Np, k = x_bnc.shape
    tn = min(n_tile, Np)
    assert Np % tn == 0
    n_tiles = Np // tn
    kk = k * k
    w1t, b1, w2t, b2, wf1t, bf1, wf2t, bf2 = kparams
    kernel = functools.partial(stn_kernel, n_valid=n_valid, tile_n=tn)
    out = pl.pallas_call(
        kernel,
        out_shape=jax.ShapeDtypeStruct((B, 1, kk), jnp.float32),
        grid=(B, n_tiles),
        in_specs=[
            pl.BlockSpec((1, tn, k), lambda b, n: (b, n, 0)),
            _const_spec(w1t.shape), _const_spec(b1.shape),
            _const_spec(w2t.shape), _const_spec(b2.shape),
            _const_spec(wf1t.shape), _const_spec(bf1.shape),
            _const_spec(wf2t.shape), _const_spec(bf2.shape),
        ],
        out_specs=pl.BlockSpec((1, 1, kk), lambda b, n: (b, 0, 0)),
        scratch_shapes=[pltpu.VMEM((1, 256), jnp.float32)],
        compiler_params=pltpu.CompilerParams(
            dimension_semantics=("parallel", "arbitrary"),
            vmem_limit_bytes=_VMEM_LIMIT),
    )(x_bnc, w1t, b1, w2t, b2, wf1t, bf1, wf2t, bf2)
    return out.reshape(B, k, k)


def run_bmm_conv_relu(x_bnc, trans, wt_bf16, b_f32, n_tile=N_TILE):
    B, Np, f = x_bnc.shape
    Kout = wt_bf16.shape[1]
    tn = min(n_tile, Np)
    assert Np % tn == 0
    return pl.pallas_call(
        bmm_conv_relu_kernel,
        out_shape=jax.ShapeDtypeStruct((B, Np, Kout), jnp.float32),
        grid=(B, Np // tn),
        in_specs=[
            pl.BlockSpec((1, tn, f), lambda b, n: (b, n, 0)),
            pl.BlockSpec((1, f, f), lambda b, n: (b, 0, 0)),
            _const_spec(wt_bf16.shape), _const_spec(b_f32.shape),
        ],
        out_specs=pl.BlockSpec((1, tn, Kout), lambda b, n: (b, n, 0)),
        compiler_params=pltpu.CompilerParams(
            dimension_semantics=("parallel", "parallel"),
            vmem_limit_bytes=_VMEM_LIMIT),
    )(x_bnc, trans, wt_bf16, b_f32)


def run_bmm_nt(y_bnk, trans, n_tile=N_TILE):
    """(B, N, K) @ (B, K, K) -> (B, K, N), lane-dense output."""
    B, Np, K = y_bnk.shape
    tn = min(n_tile, Np)
    assert Np % tn == 0
    return pl.pallas_call(
        bmm_nt_kernel,
        out_shape=jax.ShapeDtypeStruct((B, K, Np), jnp.float32),
        grid=(B, Np // tn),
        in_specs=[
            pl.BlockSpec((1, tn, K), lambda b, n: (b, n, 0)),
            pl.BlockSpec((1, K, K), lambda b, n: (b, 0, 0)),
        ],
        out_specs=pl.BlockSpec((1, K, tn), lambda b, n: (b, 0, n)),
        compiler_params=pltpu.CompilerParams(
            dimension_semantics=("parallel", "parallel"),
            vmem_limit_bytes=_VMEM_LIMIT),
    )(y_bnk, trans)


# ---------------------------------------------------------------------------
# Parameter init (deterministic, synthetic) and forward
# ---------------------------------------------------------------------------
def _w(key, shape, scale=0.1):
    return jax.random.normal(key, shape, jnp.float32) * scale


def init_stn_params(key, k):
    ks = jax.random.split(key, 8)
    return dict(
        W1=_w(ks[0], (k * k, k)),    b1=_w(ks[1], (k * k,)),     # Conv1d(k, k*k, 1)
        W2=_w(ks[2], (256, k * k)),  b2=_w(ks[3], (256,)),       # Conv1d(k*k, 256, 1)
        Wf1=_w(ks[4], (128, 256)),   bf1=_w(ks[5], (128,)),      # Linear(256, 128)
        Wf2=_w(ks[6], (k * k, 128)), bf2=_w(ks[7], (k * k,)),    # Linear(128, k*k)
        iden=jnp.eye(k, dtype=jnp.float32).reshape(-1),
    )


def init_pointnetfeat_params(key, f_dim=F_DIM, K=K_FEAT):
    k_stn, k_c1w, k_c1b, k_fstn = jax.random.split(key, 4)
    return dict(
        stn=init_stn_params(k_stn, f_dim),
        conv1_W=_w(k_c1w, (K, f_dim)),   # Conv1d(f_dim, K, 1) weight (kernel dim squeezed)
        conv1_b=_w(k_c1b, (K,)),
        fstn=init_stn_params(k_fstn, K),
    )


def _stn_kernel_params(p):
    # Pre-transpose weights to (in, out), pre-cast to bf16 (halves weight HBM/VMEM),
    # fold the identity residual into the fc2 bias.  Biases stay f32.
    bf = jnp.bfloat16
    return (p["W1"].T.astype(bf), p["b1"][None, :],
            p["W2"].T.astype(bf), p["b2"][None, :],
            p["Wf1"].T.astype(bf), p["bf1"][None, :],
            p["Wf2"].T.astype(bf), (p["bf2"] + p["iden"])[None, :])


def pointnetfeat_forward(x_bcn, params, feature_transform=True, n_tile=N_TILE):
    """x_bcn: (B, f_dim, N) float32 (PyTorch NCW).  Returns (B, K, N) float32."""
    B, C, N = x_bcn.shape
    tn = min(n_tile, _round_up(N, 8))
    n_pad = _round_up(N, tn)

    x = jnp.transpose(x_bcn, (0, 2, 1)).astype(jnp.float32)              # (B, N, f_dim)
    if n_pad != N:
        x = jnp.pad(x, ((0, 0), (0, n_pad - N), (0, 0)))                 # zero-pad points

    trans = run_stn(x, _stn_kernel_params(params["stn"]),
                    n_valid=N, n_tile=tn)                                 # (B, f, f)
    y = run_bmm_conv_relu(x, trans,
                          params["conv1_W"].T.astype(jnp.bfloat16),
                          params["conv1_b"][None, :], n_tile=tn)          # (B, n_pad, K)
    if feature_transform:
        trans_feat = run_stn(y, _stn_kernel_params(params["fstn"]),
                             n_valid=N, n_tile=tn)                        # (B, K, K)
        out = run_bmm_nt(y, trans_feat, n_tile=tn)                        # (B, K, n_pad)
    else:
        out = jnp.transpose(y, (0, 2, 1))                                 # (B, K, n_pad)
    return out[:, :, :N]                                                  # (B, K, N)


# ---------------------------------------------------------------------------
# Pure-JAX reference (mirrors the kernels' bf16-operand / f32-accumulate policy)
# ---------------------------------------------------------------------------
def _stn_ref(x_bnc, p):
    bf, f32 = jnp.bfloat16, jnp.float32
    h1 = jax.nn.relu(jnp.einsum('bnc,co->bno', x_bnc.astype(bf), p["W1"].T.astype(bf),
                                preferred_element_type=f32) + p["b1"])
    h2 = jax.nn.relu(jnp.einsum('bno,op->bnp', h1.astype(bf), p["W2"].T.astype(bf),
                                preferred_element_type=f32) + p["b2"])
    g = jnp.max(h2, axis=1)                                               # (B, 256)
    f1 = jax.nn.relu(jnp.einsum('bp,pq->bq', g.astype(bf), p["Wf1"].T.astype(bf),
                                preferred_element_type=f32) + p["bf1"])
    f2 = jnp.einsum('bq,qr->br', f1.astype(bf), p["Wf2"].T.astype(bf),
                    preferred_element_type=f32) + p["bf2"] + p["iden"]
    k = int(round(float(np.sqrt(f2.shape[-1]))))
    return f2.reshape(-1, k, k)


def _ref_forward(x_bcn, params, feature_transform=True):
    bf, f32 = jnp.bfloat16, jnp.float32
    x = jnp.transpose(x_bcn, (0, 2, 1))
    trans = _stn_ref(x, params["stn"])
    xt = jnp.einsum('bnc,bcd->bnd', x.astype(bf), trans.astype(bf),
                    preferred_element_type=f32)
    y = jax.nn.relu(jnp.einsum('bnc,ck->bnk', xt.astype(bf),
                               params["conv1_W"].T.astype(bf),
                               preferred_element_type=f32) + params["conv1_b"])
    if feature_transform:
        tf = _stn_ref(y, params["fstn"])
        y = jnp.einsum('bnk,bkj->bnj', y.astype(bf), tf.astype(bf),
                       preferred_element_type=f32)
    return jnp.transpose(y, (0, 2, 1))


# ---------------------------------------------------------------------------
if __name__ == "__main__":
    B, N = 2, 32
    key = jax.random.PRNGKey(0)
    kx, kp = jax.random.split(key)
    x = jax.random.normal(kx, (B, F_DIM, N), jnp.float32)                 # (B, C, N) NCW
    params = init_pointnetfeat_params(kp, f_dim=F_DIM, K=K_FEAT)

    out = pointnetfeat_forward(x, params, feature_transform=True)
    out = jax.block_until_ready(out)
    assert out.shape == (B, K_FEAT, N), out.shape

    ref = jax.block_until_ready(_ref_forward(x, params, feature_transform=True))
    # bf16 matmul operands (f32 accumulation) in both kernel and reference;
    # tolerance relaxed accordingly.
    np.testing.assert_allclose(np.asarray(out), np.asarray(ref), rtol=2e-2, atol=2e-2)

    print("KERNEL_OK")
</pallas_src>

<mosaic_0001>
module attributes {stable_mosaic.version = 11 : i64} {
  func.func @stn_kernel(%arg0: i32, %arg1: i32, %arg2: memref<1x32x6xf32, #tpu.memory_space<vmem>>, %arg3: memref<6x36xbf16, #tpu.memory_space<vmem>>, %arg4: memref<1x36xf32, #tpu.memory_space<vmem>>, %arg5: memref<36x256xbf16, #tpu.memory_space<vmem>>, %arg6: memref<1x256xf32, #tpu.memory_space<vmem>>, %arg7: memref<256x128xbf16, #tpu.memory_space<vmem>>, %arg8: memref<1x128xf32, #tpu.memory_space<vmem>>, %arg9: memref<128x36xbf16, #tpu.memory_space<vmem>>, %arg10: memref<1x36xf32, #tpu.memory_space<vmem>>, %arg11: memref<1x1x36xf32, #tpu.memory_space<vmem>>, %arg12: memref<1x256xf32, #tpu.memory_space<vmem>>) attributes {dimension_semantics = [#tpu.dimension_semantics<parallel>, #tpu.dimension_semantics<arbitrary>], iteration_bounds = array<i64: 2, 1>, scalar_prefetch = 0 : i64, scratch_operands = 1 : i64, tpu.core_type = #tpu.core_type<tc>, window_params = [{transform_indices = @transform_0, window_bounds = array<i64: 1, 32, 6>}, {pipeline_mode = #tpu.pipeline_mode<synchronous>, transform_indices = @transform_1, window_bounds = array<i64: 6, 36>}, {pipeline_mode = #tpu.pipeline_mode<synchronous>, transform_indices = @transform_2, window_bounds = array<i64: 1, 36>}, {pipeline_mode = #tpu.pipeline_mode<synchronous>, transform_indices = @transform_3, window_bounds = array<i64: 36, 256>}, {pipeline_mode = #tpu.pipeline_mode<synchronous>, transform_indices = @transform_4, window_bounds = array<i64: 1, 256>}, {pipeline_mode = #tpu.pipeline_mode<synchronous>, transform_indices = @transform_5, window_bounds = array<i64: 256, 128>}, {pipeline_mode = #tpu.pipeline_mode<synchronous>, transform_indices = @transform_6, window_bounds = array<i64: 1, 128>}, {pipeline_mode = #tpu.pipeline_mode<synchronous>, transform_indices = @transform_7, window_bounds = array<i64: 128, 36>}, {pipeline_mode = #tpu.pipeline_mode<synchronous>, transform_indices = @transform_8, window_bounds = array<i64: 1, 36>}, {transform_indices = @transform_9, window_bounds = array<i64: 1, 1, 36>}]} {
    %c0_i32 = arith.constant 0 : i32
    %0 = arith.cmpi eq, %arg1, %c0_i32 : i32
    %1 = arith.extui %0 : i1 to i32
    %c0_i32_0 = arith.constant 0 : i32
    %2 = arith.cmpi ne, %1, %c0_i32_0 : i32
    scf.if %2 {
      %cst_23 = arith.constant 0xFF800000 : f32
      %37 = vector.broadcast %cst_23 : f32 to vector<1x256xf32>
      %c0_24 = arith.constant 0 : index
      %c0_25 = arith.constant 0 : index
      %38 = vector.load %arg12[%c0_24, %c0_25] : memref<1x256xf32, #tpu.memory_space<vmem>>, vector<1x256xf32>
      tpu.vector_store %arg12[%c0_24, %c0_25], %37 {strides = array<i32>} : memref<1x256xf32, #tpu.memory_space<vmem>>, vector<1x256xf32>,
    } else {
    }
    %c0 = arith.constant 0 : index
    %c0_1 = arith.constant 0 : index
    %c0_2 = arith.constant 0 : index
    %3 = vector.load %arg2[%c0, %c0_1, %c0_2] : memref<1x32x6xf32, #tpu.memory_space<vmem>>, vector<1x32x6xf32>
    %4 = vector.shape_cast %3 : vector<1x32x6xf32> to vector<32x6xf32>
    %5 = arith.truncf %4 : vector<32x6xf32> to vector<32x6xbf16>
    %c0_3 = arith.constant 0 : index
    %c0_4 = arith.constant 0 : index
    %6 = vector.load %arg3[%c0_3, %c0_4] : memref<6x36xbf16, #tpu.memory_space<vmem>>, vector<6x36xbf16>
    %cst = arith.constant dense<0.000000e+00> : vector<32x36xf32>
    %7 = tpu.matmul %5, %6, %cst {dimension_numbers = #tpu.dot_dimension_numbers<[1], [0], [0], [1], [0, 0, 1, 1], [], []>} : vector<32x6xbf16>, vector<6x36xbf16>, vector<32x36xf32> -> vector<32x36xf32>
    %c0_5 = arith.constant 0 : index
    %c0_6 = arith.constant 0 : index
    %8 = vector.load %arg4[%c0_5, %c0_6] : memref<1x36xf32, #tpu.memory_space<vmem>>, vector<1x36xf32>
    %9 = vector.broadcast %8 : vector<1x36xf32> to vector<32x36xf32>
    %10 = arith.addf %7, %9 : vector<32x36xf32>
    %cst_7 = arith.constant 0.000000e+00 : f32
    %11 = vector.broadcast %cst_7 : f32 to vector<32x36xf32>
    %12 = arith.maximumf %10, %11 : vector<32x36xf32>
    %13 = arith.truncf %12 : vector<32x36xf32> to vector<32x36xbf16>
    %c0_8 = arith.constant 0 : index
    %c0_9 = arith.constant 0 : index
    %14 = vector.load %arg5[%c0_8, %c0_9] : memref<36x256xbf16, #tpu.memory_space<vmem>>, vector<36x256xbf16>
    %cst_10 = arith.constant dense<0.000000e+00> : vector<32x256xf32>
    %15 = tpu.matmul %13, %14, %cst_10 {dimension_numbers = #tpu.dot_dimension_numbers<[1], [0], [0], [1], [0, 0, 1, 1], [], []>} : vector<32x36xbf16>, vector<36x256xbf16>, vector<32x256xf32> -> vector<32x256xf32>
    %c0_11 = arith.constant 0 : index
    %c0_12 = arith.constant 0 : index
    %16 = vector.load %arg6[%c0_11, %c0_12] : memref<1x256xf32, #tpu.memory_space<vmem>>, vector<1x256xf32>
    %17 = vector.broadcast %16 : vector<1x256xf32> to vector<32x256xf32>
    %18 = arith.addf %15, %17 : vector<32x256xf32>
    %cst_13 = arith.constant 0.000000e+00 : f32
    %19 = vector.broadcast %cst_13 : f32 to vector<32x256xf32>
    %20 = arith.maximumf %18, %19 : vector<32x256xf32>
    %c32_i32 = arith.constant 32 : i32
    %21 = arith.muli %arg1, %c32_i32 : i32
    %22 = tpu.iota {dimensions = array<i32: 0>} : vector<32x256xi32>
    %23 = vector.broadcast %21 : i32 to vector<32x256xi32>
    %24 = arith.addi %22, %23 : vector<32x256xi32>
    %c32_i32_14 = arith.constant 32 : i32
    %25 = vector.broadcast %c32_i32_14 : i32 to vector<32x256xi32>
    %26 = arith.cmpi slt, %24, %25 : vector<32x256xi32>
    %cst_15 = arith.constant 0xFF800000 : f32
    %27 = vector.broadcast %cst_15 : f32 to vector<32x256xf32>
    %28 = arith.select %26, %20, %27 : vector<32x256xi1>, vector<32x256xf32>
    %c0_16 = arith.constant 0 : index
    %c0_17 = arith.constant 0 : index
    %29 = vector.load %arg12[%c0_16, %c0_17] : memref<1x256xf32, #tpu.memory_space<vmem>>, vector<1x256xf32>
    %cst_18 = arith.constant dense<0xFF800000> : vector<256xf32>
    %30 = vector.multi_reduction <maximumf>, %28, %cst_18 [0] : vector<32x256xf32> to vector<256xf32>
    %31 = vector.shape_cast %30 : vector<256xf32> to vector<1x256xf32>
    %32 = arith.maximumf %29, %31 : vector<1x256xf32>
    %c0_19 = arith.constant 0 : index
    %c0_20 = arith.constant 0 : index
    %33 = vector.load %arg12[%c0_19, %c0_20] : memref<1x256xf32, #tpu.memory_space<vmem>>, vector<1x256xf32>
    tpu.vector_store %arg12[%c0_19, %c0_20], %32 {strides = array<i32>} : memref<1x256xf32, #tpu.memory_space<vmem>>, vector<1x256xf32>,
    %c0_i32_21 = arith.constant 0 : i32
    %34 = arith.cmpi eq, %arg1, %c0_i32_21 : i32
    %35 = arith.extui %34 : i1 to i32
    %c0_i32_22 = arith.constant 0 : i32
    %36 = arith.cmpi ne, %35, %c0_i32_22 : i32
    scf.if %36 {
      %c0_23 = arith.constant 0 : index
      %c0_24 = arith.constant 0 : index
      %37 = vector.load %arg12[%c0_23, %c0_24] : memref<1x256xf32, #tpu.memory_space<vmem>>, vector<1x256xf32>
      %38 = arith.truncf %37 : vector<1x256xf32> to vector<1x256xbf16>
      %c0_25 = arith.constant 0 : index
      %c0_26 = arith.constant 0 : index
      %39 = vector.load %arg7[%c0_25, %c0_26] : memref<256x128xbf16, #tpu.memory_space<vmem>>, vector<256x128xbf16>
      %cst_27 = arith.constant dense<0.000000e+00> : vector<1x128xf32>
      %40 = tpu.matmul %38, %39, %cst_27 {dimension_numbers = #tpu.dot_dimension_numbers<[1], [0], [0], [1], [0, 0, 1, 1], [], []>} : vector<1x256xbf16>, vector<256x128xbf16>, vector<1x128xf32> -> vector<1x128xf32>
      %c0_28 = arith.constant 0 : index
      %c0_29 = arith.constant 0 : index
      %41 = vector.load %arg8[%c0_28, %c0_29] : memref<1x128xf32, #tpu.memory_space<vmem>>, vector<1x128xf32>
      %42 = arith.addf %40, %41 : vector<1x128xf32>
      %cst_30 = arith.constant 0.000000e+00 : f32
      %43 = vector.broadcast %cst_30 : f32 to vector<1x128xf32>
      %44 = arith.maximumf %42, %43 : vector<1x128xf32>
      %45 = arith.truncf %44 : vector<1x128xf32> to vector<1x128xbf16>
      %c0_31 = arith.constant 0 : index
      %c0_32 = arith.constant 0 : index
      %46 = vector.load %arg9[%c0_31, %c0_32] : memref<128x36xbf16, #tpu.memory_space<vmem>>, vector<128x36xbf16>
      %cst_33 = arith.constant dense<0.000000e+00> : vector<1x36xf32>
      %47 = tpu.matmul %45, %46, %cst_33 {dimension_numbers = #tpu.dot_dimension_numbers<[1], [0], [0], [1], [0, 0, 1, 1], [], []>} : vector<1x128xbf16>, vector<128x36xbf16>, vector<1x36xf32> -> vector<1x36xf32>
      %c0_34 = arith.constant 0 : index
      %c0_35 = arith.constant 0 : index
      %48 = vector.load %arg10[%c0_34, %c0_35] : memref<1x36xf32, #tpu.memory_space<vmem>>, vector<1x36xf32>
      %49 = arith.addf %47, %48 : vector<1x36xf32>
      %c0_36 = arith.constant 0 : index
      %c0_37 = arith.constant 0 : index
      %c0_38 = arith.constant 0 : index
      %50 = vector.load %arg11[%c0_36, %c0_37, %c0_38] : memref<1x1x36xf32, #tpu.memory_space<vmem>>, vector<1x1x36xf32>
      %51 = vector.shape_cast %50 : vector<1x1x36xf32> to vector<1x36xf32>
      %52 = vector.shape_cast %49 : vector<1x36xf32> to vector<1x1x36xf32>
      tpu.vector_store %arg11[%c0_36, %c0_37, %c0_38], %52 {strides = array<i32>} : memref<1x1x36xf32, #tpu.memory_space<vmem>>, vector<1x1x36xf32>,
    } else {
    }
    return
  }
  func.func @transform_0(%arg0: i32, %arg1: i32) -> (i32, i32, i32) {
    %c0_i32 = arith.constant 0 : i32
    %c0_i32_0 = arith.constant 0 : i32
    return %arg0, %arg1, %c0_i32 : i32, i32, i32
  }
  func.func @transform_1(%arg0: i32, %arg1: i32) -> (i32, i32) {
    %c0_i32 = arith.constant 0 : i32
    %c0_i32_0 = arith.constant 0 : i32
    %c0_i32_1 = arith.constant 0 : i32
    return %c0_i32, %c0_i32_0 : i32, i32
  }
  func.func @transform_2(%arg0: i32, %arg1: i32) -> (i32, i32) {
    %c0_i32 = arith.constant 0 : i32
    %c0_i32_0 = arith.constant 0 : i32
    %c0_i32_1 = arith.constant 0 : i32
    return %c0_i32, %c0_i32_0 : i32, i32
  }
  func.func @transform_3(%arg0: i32, %arg1: i32) -> (i32, i32) {
    %c0_i32 = arith.constant 0 : i32
    %c0_i32_0 = arith.constant 0 : i32
    %c0_i32_1 = arith.constant 0 : i32
    return %c0_i32, %c0_i32_0 : i32, i32
  }
  func.func @transform_4(%arg0: i32, %arg1: i32) -> (i32, i32) {
    %c0_i32 = arith.constant 0 : i32
    %c0_i32_0 = arith.constant 0 : i32
    %c0_i32_1 = arith.constant 0 : i32
    return %c0_i32, %c0_i32_0 : i32, i32
  }
  func.func @transform_5(%arg0: i32, %arg1: i32) -> (i32, i32) {
    %c0_i32 = arith.constant 0 : i32
    %c0_i32_0 = arith.constant 0 : i32
    %c0_i32_1 = arith.constant 0 : i32
    return %c0_i32, %c0_i32_0 : i32, i32
  }
  func.func @transform_6(%arg0: i32, %arg1: i32) -> (i32, i32) {
    %c0_i32 = arith.constant 0 : i32
    %c0_i32_0 = arith.constant 0 : i32
    %c0_i32_1 = arith.constant 0 : i32
    return %c0_i32, %c0_i32_0 : i32, i32
  }
  func.func @transform_7(%arg0: i32, %arg1: i32) -> (i32, i32) {
    %c0_i32 = arith.constant 0 : i32
    %c0_i32_0 = arith.constant 0 : i32
    %c0_i32_1 = arith.constant 0 : i32
    return %c0_i32, %c0_i32_0 : i32, i32
  }
  func.func @transform_8(%arg0: i32, %arg1: i32) -> (i32, i32) {
    %c0_i32 = arith.constant 0 : i32
    %c0_i32_0 = arith.constant 0 : i32
    %c0_i32_1 = arith.constant 0 : i32
    return %c0_i32, %c0_i32_0 : i32, i32
  }
  func.func @transform_9(%arg0: i32, %arg1: i32) -> (i32, i32, i32) {
    %c0_i32 = arith.constant 0 : i32
    %c0_i32_0 = arith.constant 0 : i32
    %c0_i32_1 = arith.constant 0 : i32
    return %arg0, %c0_i32, %c0_i32_0 : i32, i32, i32
  }
}

</mosaic_0001>

<bundles_post_ra>
// kernel: tpu_custom_call.1
= control target key start
LH: loop header
LB: loop body
LE: loop exit
PB: predicated region body
PF: predicated region fallthrough
CT: control target
= control target key end

     0   :  { %14 = vsyncpa [#allocation4], 0  ;;  %s1577_s0 = inlined_call_operand.vmem [shape: f32[2,32,6], index: 0, kind: input, shape index: {}]   ;;  %s1578_s1 = inlined_call_operand.vmem [shape: bf16[6,36], index: 1, kind: input, shape index: {}]   ;;  %s1579_s2 = inlined_call_operand.vmem [shape: f32[1,36], index: 2, kind: input, shape index: {}]   ;;  %s1580_s3 = inlined_call_operand.vmem [shape: bf16[36,256], index: 3, kind: input, shape index: {}]   ;;  %s1581_s4 = inlined_call_operand.vmem [shape: f32[1,256], index: 4, kind: input, shape index: {}]   ;;  %s1582_s5 = inlined_call_operand.vmem [shape: bf16[256,128], index: 5, kind: input, shape index: {}]   ;;  %s1583_s6 = inlined_call_operand.vmem [shape: f32[1,128], index: 6, kind: input, shape index: {}]   ;;  %s1584_s7 = inlined_call_operand.vmem [shape: bf16[128,36], index: 7, kind: input, shape index: {}]   ;;  %s1585_s8 = inlined_call_operand.vmem [shape: f32[1,36], index: 8, kind: input, shape index: {}]   ;;  %s1586_s9 = inlined_call_operand.hbm [shape: f32[2,1,36], index: 9, kind: output, shape index: {}]  }
   0x1   :  { %16 = vsyncpa [#allocation4 + $0x1], 0  ;;  %s1344_s30 = smov 0   ;;  %s1346_s10 = smov 0  }
   0x2   :  { %s1348_s11 = smov 0   ;;  %s1350_s12 = smov 0  }
   0x3   :  { %s1352_s13 = smov 0   ;;  %s1354_s14 = smov 0  }
   0x4 LB: > { %s1008_s15 = sadd.s32 4294967295, %s1286_s14   ;;  %s1009_s16 = sadd.s32 4294967294, %s1286_s14   ;;  %s1286_s14 = sphi %s1354_s14, %s22_s14   ;;  %s1282_s13 = sphi %s1352_s13, %s1595_s13   ;;  %s1278_s12 = sphi %s1350_s12, %s1594_s12   ;;  %s1274_s11 = sphi %s1348_s11, %s1593_s11   ;;  %s1270_s10 = sphi %s1346_s10, %s1592_s10   ;;  %s1266_s30 = sphi %s1344_s30, %s1591_s30  }
   0x5   : > { %s34_s17 = sadd.s32 1, %s1282_s13  ;;  %s237_s18 = sadd.s32 1, %s1274_s11 }
   0x6   : > { %p36_p0 = scmp.ge.s32.totalorder %s34_s17, 2  ;;  %p247_p1 = scmp.ne.s32.totalorder %s1274_s11, %s1270_s10 }
   0x7   : > { %p248_p2 = scmp.eq.s32.totalorder %s1008_s15, 1  ;;  %p253_p3 = scmp.ne.s32.totalorder %s1270_s10, %s1266_s30 }
   0x8   : > { %s1597_s17 = smov (%p36_p0, %s34_s17), 0  ;;  %p254_p5 = scmp.eq.s32.totalorder %s1009_s16, 1 }
   0x9   : > { %p1384_p4 = por %p248_p2, %p247_p1  ;;  %s234_s20 = ssub.s32 %s1282_s13, %s1597_s17 }
   0xa   : > { %p1012_p6 = scmp.ge.s32.totalorder %s1286_s14, 1  ;;  %p235_p7 = scmp.eq.s32.totalorder %s234_s20, 0 }
   0xb   : > { %p1391_p8 = por %p254_p5, %p253_p3  ;;  %p309_p9 = scmp.lt.s32.totalorder %s1286_s14, 3 }
   0xc   : > { %s1397_s22 = scalar_select %p235_p7, %s1274_s11, %s237_s18  }
   0xd   : > { %p310_p10 = pnand %p1012_p6, %p309_p9 }
   0xe   : > { %v374_v0 = vld [vmem:[%s1578_s1] sm:$0x7] (!%p310_p10)  ;;  %vm389_vm0 = vcmask (!%p310_p10), 1042432   ;;  %p349_p11 = scmp.lt.s32.totalorder (!%p310_p10), %s1278_s12, 1  ;;  %v1176_v2 = vld [vmem:[%s1580_s3 + $0x4] ss:$8 sps:$4 sm:$0xff] (!%p310_p10)   ;;  %v363_v17 = vlaneseq (!%p310_p10) }
   0xf   : > { %313 = sbr.rel (%p310_p10) target bundleno = 964 (0x3c4), region = 56  ;;  %1115 = vmatprep.subr.msk.bf16.mxu0 (!%p310_p10), %vm389_vm0, %v374_v0  ;;  %v391_v1 = vsel (!%p310_p10), %vm389_vm0, %v374_v0, 0  ;;  %v1178_v3 = vld [vmem:[%s1580_s3] ss:$8 sps:$4 sm:$0xff] (!%p310_p10)   ;;  %504 = vmatprep.subr.bf16.mxu1 (!%p310_p10), %v1176_v2  ;;  %vm382_vm1 = vcmask (!%p310_p10), 48128   ;;  %vm497_vm2 = vcmask (!%p310_p10), 1041408  }
  0x10   : > { %1090 = vmatpush3.bf16.msra.mxu0 (!%p310_p10), %v391_v1  ;;  %505 = vmatpush1.bf16.msra.mxu1 (!%p310_p10), %v1178_v3  ;;  %v1179_v10 = vld [vmem:[%s1580_s3 + $0x14] ss:$8 sps:$4 sm:$0xff] (!%p310_p10)   ;;  %v1181_v11 = vld [vmem:[%s1580_s3 + $0x10] ss:$8 sps:$4 sm:$0xff] (!%p310_p10)   ;;  %v452_v12 = vld [vmem:[%s1580_s3 + $0x20] sm:$0x33] (!%p310_p10) }
  0x11   : > { %506 = vmatprep.subr.bf16.mxu1 (!%p310_p10), %v1179_v10  ;;  %v1023_v13 = vcombine.high (!%p310_p10), %v452_v12, %v452_v12  ;;  %v1022_v14 = vcombine.low (!%p310_p10), %v452_v12, %v452_v12  ;;  %v1288_v16 = vmov (!%p310_p10), 0   ;;  %vm1423_vm3 = vcmp.lt.s32.totalorder (!%p310_p10), %v363_v17, 256  ;;  %v1015_v20 = vld [vmem:[%s1579_s2] ss:$0 sm:$0xff] (!%p310_p10)  ;;  %v1186_v37 = vld [vmem:[%s1582_s5 + $0x48] sm:$0xff] (!%p310_p10)   ;;  %v1188_v39 = vld [vmem:[%s1582_s5 + $0x50] sm:$0xff] (!%p310_p10)  }
  0x12   : > { %536 = vmatprep.mubr.bf16.mxu1 (!%p310_p10), %v1288_v16  ;;  %v1289_v19 = vmov (!%p310_p10), -inf   ;;  %vm490_vm4 = vcmask (!%p310_p10), 293888   ;;  %v1184_v35 = vld [vmem:[%s1582_s5 + $0x40] sm:$0xff] (!%p310_p10)   ;;  %v1187_v38 = vld [vmem:[%s1582_s5 + $0x8] sm:$0xff] (!%p310_p10)   ;;  %v1189_v40 = vld [vmem:[%s1582_s5 + $0x10] sm:$0xff] (!%p310_p10)   ;;  %v1290_v52 = vmov (!%p310_p10), 0.0  }
  0x13   : > { %v499_v15 = vsel (!%p310_p10), %vm497_vm2, %v1022_v14, 0  ;;  %367 = vst.msk [vmem:[#allocation2] sm:$0x3] (!%p310_p10), %vm1423_vm3, %v1289_v19  ;;  %v1185_v36 = vld [vmem:[%s1582_s5] sm:$0xff] (!%p310_p10)   ;;  %1058 = vmatprep.subr.bf16.mxu0 (!%p310_p10), %v1184_v35  ;;  %v1190_v41 = vld [vmem:[%s1582_s5 + $0x58] sm:$0xff] (!%p310_p10)   ;;  %v1194_v45 = vld [vmem:[%s1582_s5 + $0x68] sm:$0xff] (!%p310_p10)  }
  0x14   : > { %507 = vmatpush1.bf16.msra.mxu1 (!%p310_p10), %v1181_v11  ;;  %v1191_v42 = vld [vmem:[%s1582_s5 + $0x18] sm:$0xff] (!%p310_p10)   ;;  %v1192_v43 = vld [vmem:[%s1582_s5 + $0x60] sm:$0xff] (!%p310_p10)   ;;  %v1195_v46 = vld [vmem:[%s1582_s5 + $0x28] sm:$0xff] (!%p310_p10)   ;;  %v456_v58 = vshrl.u32 (!%p310_p10), %v363_v17, 7  ;;  %v1291_v35 = vmov (!%p310_p10), 1966171168  }
  0x15   : > { %1024 = vmatprep.subr.msk.bf16.mxu1 (!%p310_p10), %vm497_vm2, %v1023_v13  ;;  %v1193_v44 = vld [vmem:[%s1582_s5 + $0x20] sm:$0xff] (!%p310_p10)   ;;  %v1196_v47 = vld [vmem:[%s1582_s5 + $0x70] sm:$0xff] (!%p310_p10)   ;;  %v1198_v49 = vld [vmem:[%s1582_s5 + $0x78] sm:$0xff] (!%p310_p10)   ;;  %vm1292_vm5 = vmmov (!%p310_p10), 0   ;;  %s346_s28 = sand.u32 (!%p310_p10), 1, %s1270_s10   ;;  %s1051_s16 = sshll.u32 (!%p310_p10), %s1278_s12, 4 }
  0x16   : > { %s350_s29 = scalar_select %p349_p11, %s1278_s12, 1  ;;  %v1197_v48 = vld [vmem:[%s1582_s5 + $0x30] sm:$0xff]   ;;  %v1199_v50 = vld [vmem:[%s1582_s5 + $0x38] sm:$0xff]   ;;  %v1200_v51 = vld [vmem:[%s1584_s7] sm:$0xff]   ;;  %v457_v59 = vsub.s32 0, %v456_v58  ;;  %v461_v61 = vsub.s32 1, %v456_v58 }
  0x17   : > { %v1201_v53 = vld [vmem:[%s1584_s7 + $0x8] sm:$0xff]   ;;  %v1202_v54 = vld [vmem:[%s1584_s7 + $0x10] sm:$0xff]   ;;  %v1203_v55 = vld [vmem:[%s1584_s7 + $0x18] sm:$0xff]   ;;  %s347_s18 = scalar_lea.vmem [#allocation3], %s346_s28  ;;  %vm924_vm6 = vcmask 286720   ;;  %s1530_s25 = scalar_lea.hbm %s1586_s9, %s1051_s16 }
  0x18   : > { %s1054_s15 = sshll.u32 %s350_s29, 5  ;;  %509 = vmatpush1.bf16.msra.mxu1 %v499_v15  ;;  %v1204_v56 = vld [vmem:[%s1584_s7 + $0x20] sm:$0xff]   ;;  %v1205_v57 = vld [vmem:[%s1584_s7 + $0x28] sm:$0xff]   ;;  %v1207_v18 = vld [vmem:[%s1584_s7 + $0x38] sm:$0xff]   ;;  %s927_s12 = scalar_lea.sflag [#allocation4], %s346_s28 }
  0x19   : > { %s356_s20 = scalar_lea.vmem %s1577_s0, %s1054_s15  ;;  %1095 = vmatprep.subr.bf16.mxu1 %v1290_v52  ;;  %v453_v60 = vld [vmem:[%s1581_s4] sm:$0x3]  ;;  %s1293_s27 = smov [#allocation3]  }
  0x1a   : > { %v368_v4 = vld [vmem:[%s356_s20] sm:$0xff]  ;;  %v369_v5 = vld [vmem:[%s356_s20 + $0x8] sm:$0xff]  ;;  %v370_v6 = vld [vmem:[%s356_s20 + $0x10] sm:$0xff]  ;;  %v458_v62 = vrot.slane %v453_v60, %v457_v59  ;;  %v462_v63 = vrot.slane %v453_v60, %v461_v61  ;;  %s1212_s29 = sshll.u32 %s1293_s27, 4  ;;  %s1213_s29 = int_to_ptr.vmem [resolvable:$false] %s1212_s29 }
  0x1b   : > { %v372_v7 = vpack.c.bf16 %v369_v5, %v368_v4  ;;  %v371_v8 = vld [vmem:[%s356_s20 + $0x18] sm:$0xff]  ;;  %v1206_v60 = vld [vmem:[%s1584_s7 + $0x30] sm:$0xff]   ;;  %s939_s20 = sshll.u32 %s347_s18, 4  ;;  %s1214_s15 = scalar_lea.vmem %s1213_s29, 32  ;;  %s1532_s20 = int_to_ptr.vmem [resolvable:$true] %s939_s20 }
  0x1c   : > { %v373_v9 = vpack.c.bf16 %v371_v8, %v370_v6  ;;  %s1208_s26 = scalar_lea.vmem %s1532_s20, 16  ;;  %p1215_p1 = scmp.lt.s32.totalorder %s1532_s20, %s1213_s29 }
  0x1d   : > { %1091 = vmatprep.mubr.msk.bf16.mxu0 %vm382_vm1, %v372_v7  ;;  %p1209_p12 = scmp.ne.s32.totalorder %s1532_s20, %s1208_s26  ;;  %p1216_p2 = scmp.lt.s32.totalorder %s1214_s15, %s1208_s26 }
  0x1e   : > { %1092 = vmatmul.mubr.msk.bf16.vlgmr.msra.gmra.mrb[0].mxu0 %vm382_vm1, %v373_v9 }
  0x1f   : > { %1059 = vmatpush3.bf16.msra.mxu0 %v1185_v36  ;;  %v611_v36 = vunpack.c.l.s4 %v1291_v35  ;;  %p1210_p13 = pnand %p1209_p12, %p1384_p4  ;;  %p1217_p3 = por %p1216_p2, %p1215_p1 }
  0x20   : > { %1060 = vmatprep.subr.bf16.mxu0 %v1186_v37 }
  0x21   : > { %p1211_p0 = pneg %p1210_p13 }
  0x23   : > { %1061 = vmatpush3.bf16.msra.mxu0 %v1187_v38  ;;  %p1218_p5 = pnand %p1217_p3, %p1211_p0 }
  0x24   : > { %1062 = vmatprep.subr.bf16.mxu0 %v1188_v39 }
  0x27   : > { %1063 = vmatpush3.bf16.msra.mxu0 %v1189_v40 }
  0x28   : > { %1064 = vmatprep.subr.bf16.mxu0 %v1190_v41  ;;  %v612_v41 = vunpack.c.0.s8 %v611_v36 }
  0x2b   : > { %1065 = vmatpush3.bf16.msra.mxu0 %v1191_v42 }
  0x2c   : > { %1066 = vmatprep.subr.bf16.mxu0 %v1192_v43 }
  0x2f   : > { %1067 = vmatpush3.bf16.msra.mxu0 %v1193_v44 }
  0x30   : > { %1068 = vmatprep.subr.bf16.mxu0 %v1194_v45 }
  0x33   : > { %1069 = vmatpush3.bf16.msra.mxu0 %v1195_v46  ;;  %v615_v46 = vsub.s32 %v612_v41, %v456_v58 }
  0x34   : > { %1070 = vmatprep.subr.bf16.mxu0 %v1196_v47 }
  0x37   : > { %1071 = vmatpush3.bf16.msra.mxu0 %v1197_v48 }
  0x38   : > { %1072 = vmatprep.subr.bf16.mxu0 %v1198_v49  ;;  %v588_v49 = vld [vmem:[#allocation2] sm:$0x3] }
  0x3b   : > { %1073 = vmatpush3.bf16.msra.mxu0 %v1199_v50 }
  0xf1   : > { %v1093_v21 = vpop.f32.mrb[0].mxu0 }
  0xf2   : > { %v436_v22 = vadd.f32 %v1093_v21, %v1015_v20  ;;  %v427_v23 = vpop.f32.mrb[1].mxu0 }
  0xf3   : > { %v428_v24 = vadd.f32 %v1015_v20, %v427_v23  ;;  %v1094_v25 = vpop.f32.mrb[2].mxu0 }
  0xf4   : > { %v439_v26 = vadd.f32 %v1094_v25, %v1015_v20  ;;  %v430_v27 = vpop.f32.mrb[3].mxu0  ;;  %v444_v29 = vmax.f32 %v436_v22, 0.0 }
  0xf5   : > { %v431_v28 = vadd.f32 %v1015_v20, %v430_v27  ;;  %v442_v31 = vmax.f32 %v428_v24, 0.0 }
  0xf6   : > { %v445_v30 = vmax.f32 %v439_v26, 0.0 }
  0xf7   : > { %v443_v32 = vmax.f32 %v431_v28, 0.0 }
  0xf8   : > { %v447_v33 = vpack.c.bf16 %v445_v30, %v444_v29 }
  0xf9   : > { %v446_v34 = vpack.c.bf16 %v443_v32, %v442_v31 }
  0xfb   : > { %1025 = vmatmul.mubr.msk.bf16.vlgmr.msra.gmra.mrb[0].mxu1 %vm490_vm4, %v446_v34 }
  0xfc   : > { %546 = vmatprep.mubr.bf16.mxu1 %v1288_v16  ;;  %1096 = vmatpush3.bf16.msra.mxu1 %v1200_v51 }
  0xfd   : > { %1097 = vmatprep.subr.bf16.mxu1 %v1290_v52 }
 0x100   : > { %1098 = vmatpush3.bf16.msra.mxu1 %v1201_v53 }
 0x101   : > { %1099 = vmatprep.subr.bf16.mxu1 %v1290_v52 }
 0x103   : > { %1026 = vmatmul.mubr.msk.bf16.gmra.mrb[4].mxu1 %vm490_vm4, %v447_v33 }
 0x104   : > { %1100 = vmatpush3.bf16.msra.mxu1 %v1202_v54  ;;  %1111 = vmatprep.mubr.msk.bf16.mxu1 %vm1292_vm5, %v1290_v52 }
 0x105   : > { %1101 = vmatprep.subr.bf16.mxu1 %v1290_v52 }
 0x108   : > { %1102 = vmatpush3.bf16.msra.mxu1 %v1203_v55 }
 0x109   : > { %1103 = vmatprep.subr.bf16.mxu1 %v1290_v52 }
 0x10c   : > { %1104 = vmatpush3.bf16.msra.mxu1 %v1204_v56 }
 0x10d   : > { %1105 = vmatprep.subr.bf16.mxu1 %v1290_v52 }
 0x110   : > { %1106 = vmatpush3.bf16.msra.mxu1 %v1205_v57 }
 0x111   : > { %1107 = vmatprep.subr.bf16.mxu1 %v1290_v52 }
 0x114   : > { %1108 = vmatpush3.bf16.msra.mxu1 %v1206_v60 }
 0x115   : > { %1109 = vmatprep.subr.bf16.mxu1 %v1290_v52 }
 0x118   : > { %1110 = vmatpush3.bf16.msra.mxu1 %v1207_v18 }
 0x1ce   : > { %v538_v0 = vpop.f32.mrb[0].mxu1 }
 0x1cf   : > { %v539_v1 = vadd.f32 %v538_v0, %v458_v62  ;;  %v540_v2 = vpop.f32.mrb[1].mxu1 }
 0x1d0   : > { %v541_v3 = vadd.f32 %v540_v2, %v462_v63  ;;  %v542_v4 = vpop.f32.mrb[2].mxu1 }
 0x1d1   : > { %v543_v5 = vadd.f32 %v542_v4, %v458_v62  ;;  %v544_v6 = vpop.f32.mrb[3].mxu1  ;;  %v557_v13 = vmax.f32 %v539_v1, 0.0  ;;  %v835_v4 = vld [vmem:[%s1585_s8] sm:$0x1] }
 0x1d2   : > { %v545_v7 = vadd.f32 %v544_v6, %v462_v63  ;;  %v558_v17 = vmax.f32 %v541_v3, 0.0 }
 0x1d3   : > { %v559_v21 = vmax.f32 %v543_v5, 0.0 }
 0x1d4   : > { %v560_v24 = vmax.f32 %v545_v7, 0.0 }
 0x1d6   : > { %v548_v8 = vpop.f32.mrb[4].mxu1 }
 0x1d7   : > { %v549_v9 = vadd.f32 %v548_v8, %v458_v62  ;;  %v550_v10 = vpop.f32.mrb[5].mxu1 }
 0x1d8   : > { %v551_v11 = vadd.f32 %v550_v10, %v462_v63  ;;  %v552_v12 = vpop.f32.mrb[6].mxu1 }
 0x1d9   : > { %v561_v14 = vmax.f32 %v549_v9, 0.0  ;;  %v553_v15 = vadd.f32 %v552_v12, %v458_v62  ;;  %v554_v16 = vpop.f32.mrb[7].mxu1 }
 0x1da   : > { %v562_v19 = vmax.f32 %v551_v11, 0.0  ;;  %v555_v20 = vadd.f32 %v554_v16, %v462_v63 }
 0x1db   : > { %v589_v22 = vmax.f32 %v557_v13, %v561_v14  ;;  %v563_v23 = vmax.f32 %v553_v15, 0.0 }
 0x1dc   : > { %v598_v25 = vmax.f32 %v558_v17, %v562_v19  ;;  %v564_v26 = vmax.f32 %v555_v20, 0.0 }
 0x1dd   : > { %v590_v27 = vmax.f32 %v559_v21, %v563_v23 }
 0x1de   : > { %v599_v28 = vmax.f32 %v560_v24, %v564_v26 }
 0x1df   : > { %v591_v29 = vmax.f32 %v589_v22, %v590_v27 }
 0x1e0   : > { %v600_v30 = vmax.f32 %v598_v25, %v599_v28 }
 0x1e1   : > { %v592_v31 = vrot.slane %v591_v29, 4 }
 0x1e2   : > { %v601_v32 = vrot.slane %v600_v30, 4 }
 0x1e3   : > { %v593_v33 = vmax.f32 %v591_v29, %v592_v31 }
 0x1e4   : > { %v602_v34 = vmax.f32 %v600_v30, %v601_v32 }
 0x1e5   : > { %v594_v37 = vrot.slane %v593_v33, 2 }
 0x1e6   : > { %v603_v38 = vrot.slane %v602_v34, 2 }
 0x1e7   : > { %v595_v39 = vmax.f32 %v593_v33, %v594_v37 }
 0x1e8   : > { %v604_v40 = vmax.f32 %v602_v34, %v603_v38 }
 0x1e9   : > { %v596_v42 = vrot.slane %v595_v39, 1 }
 0x1ea   : > { %v605_v43 = vrot.slane %v604_v40, 1 }
 0x1eb   : > { %v597_v44 = vmax.f32 %v595_v39, %v596_v42 }
 0x1ec   : > { %v606_v45 = vmax.f32 %v604_v40, %v605_v43 }
 0x1ee   : > { %v609_v47 = vcombine.low %v597_v44, %v606_v45 }
 0x1f0   : > { %v616_v48 = vrot.slane %v609_v47, %v615_v46 }
 0x1f2   : > { %v623_v50 = vrot.slane %v616_v48, %v615_v46 }
 0x1f4   : > { %v625_v51 = vmax.f32 %v588_v49, %v623_v50 }
 0x1f6   : > { %630 = vst.msk [vmem:[#allocation2] sm:$0x3] %vm1423_vm3, %v625_v51 }
 0x1fd   : > { %v634_v53 = vld [vmem:[#allocation2] sm:$0x3] }
 0x1fe   : > { %v639_v54 = vrot.slane %v634_v53, %v457_v59  ;;  %v643_v55 = vrot.slane %v634_v53, %v461_v61  ;;  %v680_v59 = vld [vmem:[%s1583_s6] sm:$0x1] }
 0x200   : > { %v646_v56 = vpack.c.bf16 %v639_v54, %v639_v54  ;;  %v647_v57 = vpack.c.bf16 %v643_v55, %v643_v55 }
 0x202   : > { %809 = vmatprep.mubr.bf16.mxu0 %v647_v57 }
 0x203   : > { %810 = vmatmul.mubr.bf16.vlgmr.msra.gmra.mrb[4].mxu0 %v646_v56 }
 0x2d6   : > { %v1074_v58 = vpop.f32.mrb[4].mxu0 }
 0x2d7   : > { %v1075_v61 = vpop.f32.mrb[5].mxu0 }
 0x2d8   : > { %v1076_v62 = vadd.f32 %v1075_v61, %v1074_v58  ;;  %v1077_v63 = vpop.f32.mrb[6].mxu0 }
 0x2d9   : > { %v1078_v0 = vpop.f32.mrb[7].mxu0 }
 0x2da   : > { %v812_v1 = vadd.f32 %v1076_v62, %v680_v59 }
 0x2dc   : > { %v817_v2 = vmax.f32 %v812_v1, 0.0 }
 0x2de   : > { %v818_v3 = vpack.c.bf16 %v817_v2, %v817_v2 }
 0x2e0   : > { %1112 = vmatmul.mubr.bf16.vlgmr.msra.gmra.mrb[8].mxu1 %v818_v3 }
 0x3b3   : > { %v918_v52 = vpop.f32.mrb[8].mxu1 }
 0x3b4   : > { %v919_v5 = vadd.f32 %v918_v52, %v835_v4  ;;  %v1113_v6 = vpop.f32.mrb[9].mxu1 }
 0x3b5   : > { %v921_v7 = vpop.f32.mrb[10].mxu1 }
 0x3b6   : > { %v1114_v8 = vpop.f32.mrb[11].mxu1  ;;  %925 = vst.msk [vmem:[%s347_s18] sm:$0x1] %vm924_vm6, %v919_v5 }
 0x3b7   : > { %1221 = shalt.err (!%p1218_p5)
}
 0x3b8   : > { %s1222_s28 = scalar_lea.hbm %s1530_s25, 16  ;;  %s1226_s23 = scalar_lea.hbm %s1586_s9, 32 }
 0x3b9   : > { %p1223_p6 = scmp.ne.s32.totalorder %s1530_s25, %s1222_s28  ;;  %p1227_p10 = scmp.lt.u32.totalorder %s1530_s25, %s1586_s9 }
 0x3ba   : > { %p1228_p11 = scmp.lt.u32.totalorder %s1226_s23, %s1222_s28  ;;  %p1230_p13 = scmp.lt.u32.totalorder %s1222_s28, %s1530_s25 }
 0x3bb   : > { %p1224_p7 = pnand %p1223_p6, %p1384_p4 }
 0x3bc   : > { %p1229_p12 = por %p1228_p11, %p1227_p10 }
 0x3bd   : > { %p1225_p9 = pneg %p1224_p7 }
 0x3be   : > { %p1231_p0 = por %p1230_p13, %p1229_p12 }
 0x3c0   : > { %p1232_p1 = pnand %p1231_p0, %p1225_p9 }
 0x3c2   : > { %1235 = shalt.err (!%p1232_p1)
}
 0x3c3   : > { %1116 = dma.vmem_to_hbm [thread:$0]  (%p1384_p4), %s1532_s20, 16, %s1530_s25, %s927_s12  }
 0x3c4 PF: > { %p1122_p2 = scmp.ge.s32.totalorder %s1286_s14, 2  ;;  %s951_s26 = sand.u32 1, %s1266_s30  }
 0x3c5   : > { %s952_s29 = scalar_lea.sflag [#allocation4], %s951_s26 }
 0x3c6   : > { %p1119_p3 = pnand %p1122_p2, %p1391_p8 }
 0x3c8   : > { %1261 = dma.done.wait (!%p1119_p3), %s952_s29, 16  }
 0x3c9   : > { %1263 = vsyncadd (!%p1119_p3), %s952_s29, 4294967280  ;;  %s22_s14 = sadd.s32 1, %s1286_s14   ;;  %s1591_s30 = smov %s1270_s10 }
 0x3ca   : > { %p19_p5 = scmp.ge.s32.totalorder %s22_s14, 4   ;;  %s1592_s10 = smov %s1274_s11 }
 0x3cb   : > { %s1593_s11 = smov %s1397_s22  ;;  %s1594_s12 = smov %s1282_s13 }
 0x3cc   : > { %s1595_s13 = smov %s1597_s17  ;;  %21 = sbr.rel (!%p19_p5) target bundleno = 4 (0x4), region = 99 }
 0x3d3   :  { %956 = vsyncpa [#allocation4], 1 }
 0x3d4   :  { %958 = vsyncpa [#allocation4 + $0x1], 1 }

</bundles_post_ra>
